<compile_context>
chip_gen: v7x
topology: tpu7x:2x2x1
jax: 0.10.0
libtpu: 0.0.40
codegen_flags: <defaults>
</compile_context>

<pallas_src>
import functools

import jax
import jax.numpy as jnp
from jax.experimental import pallas as pl
from jax.experimental.pallas import tpu as pltpu

EPS = 1e-6
LANE = 128


def _rel_err_kernel(x_ref, t_ref, o_ref, *, tile_rows, rows_valid):
    i = pl.program_id(0)

    x = x_ref[...].astype(jnp.float32)
    t = t_ref[...].astype(jnp.float32)
    # Exact division (mem-bound kernel: divide cost is hidden; keeps the
    # rtol=1e-5 check comfortable vs. approx reciprocal).
    rel = jnp.abs(t - x) / (t + EPS)

    def _reduce(vals):
        # (tile_rows, 128) -> (tile_rows//8, 8, 128) follows native (8,128)
        # vreg tiles, so the axis-0 sum is pure elementwise VPU adds.
        v3 = vals.reshape(tile_rows // 8, 8, LANE)
        return jnp.sum(v3, axis=0, keepdims=True)  # (1, 8, 128)

    block_start = i * tile_rows
    is_full = block_start + tile_rows <= rows_valid

    @pl.when(is_full)
    def _():
        o_ref[...] = _reduce(rel)

    @pl.when(jnp.logical_not(is_full))
    def _():
        # Last (partial) block: rows beyond rows_valid hold undefined data
        # from the clamped DMA; zero them before reducing.
        row_ids = jax.lax.broadcasted_iota(jnp.int32, (tile_rows, LANE), 0)
        mask = (block_start + row_ids) < rows_valid
        o_ref[...] = _reduce(jnp.where(mask, rel, 0.0))


def rel_error_loss(inp, target, *, tile_rows=2048):
    """Pallas equivalent of torch.mean(|target - input| / (target + 1e-6))."""
    assert inp.shape == target.shape
    total_n = inp.size

    x = inp.reshape(-1)
    t = target.reshape(-1)

    n = x.shape[0]
    pad = (-n) % LANE
    if pad:
        # Only a <128-element lane tail ever needs host-side padding; padded
        # (x=0, t=0) elements give |0-0|/(0+eps) == 0 and the mean divides by
        # the true total_n, so they contribute nothing.
        x = jnp.pad(x, (0, pad))
        t = jnp.pad(t, (0, pad))

    rows = x.shape[0] // LANE
    x2 = x.reshape(rows, LANE)
    t2 = t.reshape(rows, LANE)

    # Clamp tile to the data size (rounded up to a multiple of 8 sublanes).
    tr = min(tile_rows, ((rows + 7) // 8) * 8)
    tr = max(tr, 8)
    num_blocks = pl.cdiv(rows, tr)

    partials = pl.pallas_call(
        functools.partial(_rel_err_kernel, tile_rows=tr, rows_valid=rows),
        out_shape=jax.ShapeDtypeStruct((num_blocks, 8, LANE), jnp.float32),
        grid_spec=pltpu.PrefetchScalarGridSpec(
            num_scalar_prefetch=0,
            grid=(num_blocks,),
            in_specs=[
                pl.BlockSpec((tr, LANE), lambda i: (i, 0)),
                pl.BlockSpec((tr, LANE), lambda i: (i, 0)),
            ],
            out_specs=pl.BlockSpec((1, 8, LANE), lambda i: (i, 0, 0)),
        ),
        compiler_params=pltpu.CompilerParams(
            dimension_semantics=("parallel",),
        ),
    )(x2, t2)

    # Tiny final reduction + mean outside the kernel.
    return jnp.sum(partials) / jnp.float32(total_n)


if __name__ == "__main__":
    key = jax.random.PRNGKey(0)
    k1, k2 = jax.random.split(key)
    shape = (2, 4, 16, 16)
    inp = jax.random.normal(k1, shape, dtype=jnp.float32)
    # Keep targets away from -eps to avoid division blowups in the reference.
    target = jax.random.uniform(k2, shape, dtype=jnp.float32, minval=0.5, maxval=2.0)

    loss = rel_error_loss(inp, target)
    jax.block_until_ready(loss)

    # Pure-JAX reference check.
    ref = jnp.mean(jnp.abs(target - inp) / (target + EPS))
    assert jnp.allclose(loss, ref, rtol=1e-5, atol=1e-6), (loss, ref)

    print("KERNEL_OK")
</pallas_src>

<mosaic_0001>
module attributes {stable_mosaic.version = 11 : i64} {
  func.func @_rel_err_kernel(%arg0: i32, %arg1: memref<16x128xf32, #tpu.memory_space<vmem>>, %arg2: memref<16x128xf32, #tpu.memory_space<vmem>>, %arg3: memref<1x8x128xf32, #tpu.memory_space<vmem>>) attributes {dimension_semantics = [#tpu.dimension_semantics<parallel>], iteration_bounds = array<i64: 1>, scalar_prefetch = 0 : i64, scratch_operands = 0 : i64, tpu.core_type = #tpu.core_type<tc>, window_params = [{transform_indices = @transform_0, window_bounds = array<i64: 16, 128>}, {transform_indices = @transform_1, window_bounds = array<i64: 16, 128>}, {transform_indices = @transform_2, window_bounds = array<i64: 1, 8, 128>}]} {
    %c0 = arith.constant 0 : index
    %c0_0 = arith.constant 0 : index
    %0 = vector.load %arg1[%c0, %c0_0] : memref<16x128xf32, #tpu.memory_space<vmem>>, vector<16x128xf32>
    %c0_1 = arith.constant 0 : index
    %c0_2 = arith.constant 0 : index
    %1 = vector.load %arg2[%c0_1, %c0_2] : memref<16x128xf32, #tpu.memory_space<vmem>>, vector<16x128xf32>
    %2 = arith.subf %1, %0 : vector<16x128xf32>
    %3 = math.absf %2 : vector<16x128xf32>
    %cst = arith.constant 9.99999997E-7 : f32
    %4 = vector.broadcast %cst : f32 to vector<16x128xf32>
    %5 = arith.addf %1, %4 : vector<16x128xf32>
    %6 = arith.divf %3, %5 : vector<16x128xf32>
    %c16_i32 = arith.constant 16 : i32
    %7 = arith.muli %arg0, %c16_i32 : i32
    %c16_i32_3 = arith.constant 16 : i32
    %8 = arith.addi %7, %c16_i32_3 : i32
    %c16_i32_4 = arith.constant 16 : i32
    %9 = arith.cmpi sle, %8, %c16_i32_4 : i32
    %10 = arith.extui %9 : i1 to i32
    %c0_i32 = arith.constant 0 : i32
    %11 = arith.cmpi ne, %10, %c0_i32 : i32
    scf.if %11 {
      %15 = vector.shape_cast %6 : vector<16x128xf32> to vector<2x8x128xf32>
      %cst_6 = arith.constant dense<0.000000e+00> : vector<8x128xf32>
      %16 = vector.multi_reduction <add>, %15, %cst_6 [0] : vector<2x8x128xf32> to vector<8x128xf32>
      %17 = vector.shape_cast %16 : vector<8x128xf32> to vector<1x8x128xf32>
      %c0_7 = arith.constant 0 : index
      %c0_8 = arith.constant 0 : index
      %c0_9 = arith.constant 0 : index
      %18 = vector.load %arg3[%c0_7, %c0_8, %c0_9] : memref<1x8x128xf32, #tpu.memory_space<vmem>>, vector<1x8x128xf32>
      tpu.vector_store %arg3[%c0_7, %c0_8, %c0_9], %17 {strides = array<i32>} : memref<1x8x128xf32, #tpu.memory_space<vmem>>, vector<1x8x128xf32>,
    } else {
    }
    %true = arith.constant true
    %12 = arith.xori %9, %true : i1
    %13 = arith.extui %12 : i1 to i32
    %c0_i32_5 = arith.constant 0 : i32
    %14 = arith.cmpi ne, %13, %c0_i32_5 : i32
    scf.if %14 {
      %15 = tpu.iota {dimensions = array<i32: 0>} : vector<16x128xi32>
      %16 = vector.broadcast %7 : i32 to vector<16x128xi32>
      %17 = arith.addi %16, %15 : vector<16x128xi32>
      %c16_i32_6 = arith.constant 16 : i32
      %18 = vector.broadcast %c16_i32_6 : i32 to vector<16x128xi32>
      %19 = arith.cmpi slt, %17, %18 : vector<16x128xi32>
      %cst_7 = arith.constant 0.000000e+00 : f32
      %20 = vector.broadcast %cst_7 : f32 to vector<16x128xf32>
      %21 = arith.select %19, %6, %20 : vector<16x128xi1>, vector<16x128xf32>
      %22 = vector.shape_cast %21 : vector<16x128xf32> to vector<2x8x128xf32>
      %cst_8 = arith.constant dense<0.000000e+00> : vector<8x128xf32>
      %23 = vector.multi_reduction <add>, %22, %cst_8 [0] : vector<2x8x128xf32> to vector<8x128xf32>
      %24 = vector.shape_cast %23 : vector<8x128xf32> to vector<1x8x128xf32>
      %c0_9 = arith.constant 0 : index
      %c0_10 = arith.constant 0 : index
      %c0_11 = arith.constant 0 : index
      %25 = vector.load %arg3[%c0_9, %c0_10, %c0_11] : memref<1x8x128xf32, #tpu.memory_space<vmem>>, vector<1x8x128xf32>
      tpu.vector_store %arg3[%c0_9, %c0_10, %c0_11], %24 {strides = array<i32>} : memref<1x8x128xf32, #tpu.memory_space<vmem>>, vector<1x8x128xf32>,
    } else {
    }
    return
  }
  func.func @transform_0(%arg0: i32) -> (i32, i32) {
    %c0_i32 = arith.constant 0 : i32
    %c0_i32_0 = arith.constant 0 : i32
    return %arg0, %c0_i32 : i32, i32
  }
  func.func @transform_1(%arg0: i32) -> (i32, i32) {
    %c0_i32 = arith.constant 0 : i32
    %c0_i32_0 = arith.constant 0 : i32
    return %arg0, %c0_i32 : i32, i32
  }
  func.func @transform_2(%arg0: i32) -> (i32, i32, i32) {
    %c0_i32 = arith.constant 0 : i32
    %c0_i32_0 = arith.constant 0 : i32
    %c0_i32_1 = arith.constant 0 : i32
    return %arg0, %c0_i32, %c0_i32_0 : i32, i32, i32
  }
}

</mosaic_0001>

<bundles_post_ra>
// kernel: tpu_custom_call.1
= control target key start
LH: loop header
LB: loop body
LE: loop exit
PB: predicated region body
PF: predicated region fallthrough
CT: control target
= control target key end

     0   :  { %7 = vsyncpa [#allocation3], 0  ;;  %s231_s0 = inlined_call_operand.hbm [shape: f32[16,128], index: 0, kind: input, shape index: {}]   ;;  %s232_s1 = inlined_call_operand.hbm [shape: f32[16,128], index: 1, kind: input, shape index: {}]   ;;  %s233_s2 = inlined_call_operand.hbm [shape: f32[1,8,128], index: 2, kind: output, shape index: {}]  }
   0x1   :  { %8 = vsyncpa [#allocation6], 0 }
   0x2   :  { %9 = vsyncpa [#allocation4], 0  ;;  %s175_s9 = smov [#allocation2]   ;;  %s103_s13 = scalar_lea.hbm %s231_s0, 256 }
   0x3   :  { %s15_s10 = sshll.u32 %s175_s9, 4  ;;  %p104_p0 = scmp.ne.s32.totalorder %s231_s0, %s103_s13  ;;  %s16_s10 = int_to_ptr.vmem [resolvable:$true] %s15_s10 }
   0x4   :  { %p107_p1 = scmp.lt.u32.totalorder %s103_s13, %s231_s0 }
   0x6   :  { %p109_p2 = pnand %p107_p1, %p104_p0 }
   0x8   :  { %112 = shalt.err (!%p109_p2)
}
   0x9   :  { %s113_s18 = scalar_lea.vmem %s16_s10, 256  ;;  %p118_p4 = scmp.lt.s32.totalorder %s16_s10, %s16_s10 }
   0xa   :  { %p114_p3 = scmp.ne.s32.totalorder %s16_s10, %s113_s18  ;;  %p119_p5 = scmp.lt.s32.totalorder %s113_s18, %s113_s18 }
   0xc   :  { %p120_p6 = por %p119_p5, %p118_p4 }
   0xe   :  { %p121_p7 = pnand %p120_p6, %p114_p3 }
  0x10   :  { %124 = shalt.err (!%p121_p7)
}
  0x11   :  { %s176_s19 = smov 128   ;;  %s177_s20 = smov 8  }
  0x12   :  { %21 = dma.hbm_to_vmem [thread:$0]  %s231_s0, 256, %s16_s10, [#allocation3], %s176_s19, %s176_s19, %s177_s20  }
  0x13   :  { %s178_s23 = smov [#allocation5]   ;;  %s125_s27 = scalar_lea.hbm %s232_s1, 256 }
  0x14   :  { %s27_s24 = sshll.u32 %s178_s23, 4  ;;  %p126_p8 = scmp.ne.s32.totalorder %s232_s1, %s125_s27  ;;  %s28_s24 = int_to_ptr.vmem [resolvable:$true] %s27_s24 }
  0x15   :  { %p129_p9 = scmp.lt.u32.totalorder %s125_s27, %s232_s1 }
  0x17   :  { %p131_p10 = pnand %p129_p9, %p126_p8 }
  0x19   :  { %134 = shalt.err (!%p131_p10)
}
  0x1a   :  { %s135_s4 = scalar_lea.vmem %s28_s24, 256  ;;  %p140_p12 = scmp.lt.s32.totalorder %s28_s24, %s28_s24 }
  0x1b   :  { %p136_p11 = scmp.ne.s32.totalorder %s28_s24, %s135_s4  ;;  %p141_p13 = scmp.lt.s32.totalorder %s135_s4, %s135_s4 }
  0x1d   :  { %p142_p0 = por %p141_p13, %p140_p12 }
  0x1f   :  { %p143_p1 = pnand %p142_p0, %p136_p11 }
  0x21   :  { %146 = shalt.err (!%p143_p1)
}
  0x22   :  { %33 = dma.hbm_to_vmem [thread:$0]  %s232_s1, 256, %s28_s24, [#allocation6], %s176_s19, %s176_s19, %s177_s20  }
  0x23   :  { %169 = dma.done.wait [#allocation3], 256  }
  0x24   :  { %170 = vsyncadd [#allocation3], 4294967040 }
  0x25   :  { %171 = dma.done.wait [#allocation6], 256  }
  0x26   :  { %172 = vsyncadd [#allocation6], 4294967040  ;;  %v42_v0 = vld [vmem:[#allocation5] sm:$0xff]  ;;  %v43_v1 = vld [vmem:[#allocation5 + $0x8] sm:$0xff]  ;;  %s179_s1 = smov [#allocation7]  }
  0x27   :  { %v48_v2 = vadd.f32 1e-06, %v42_v0  ;;  %v49_v3 = vadd.f32 1e-06, %v43_v1  ;;  %v40_v4 = vld [vmem:[#allocation2] sm:$0xff]  ;;  %v41_v5 = vld [vmem:[#allocation2 + $0x8] sm:$0xff] }
  0x28   :  { %v44_v6 = vsub.f32 %v42_v0, %v40_v4  ;;  %v45_v7 = vsub.f32 %v43_v1, %v41_v5  ;;  %s84_s6 = sshll.u32 %s179_s1, 4  ;;  %s85_s6 = int_to_ptr.vmem [resolvable:$true] %s84_s6 }
  0x29   :  { %99 = vrcp.f32 %v48_v2  ;;  %s147_s7 = scalar_lea.vmem %s85_s6, 128  ;;  %p152_p3 = scmp.lt.s32.totalorder %s85_s6, %s85_s6 }
  0x2a   :  { %101 = vrcp.f32 %v49_v3  ;;  %v46_v8 = vand.u32 2147483647, %v44_v6  ;;  %v47_v9 = vand.u32 2147483647, %v45_v7  ;;  %p148_p2 = scmp.ne.s32.totalorder %s85_s6, %s147_s7  ;;  %p153_p4 = scmp.lt.s32.totalorder %s147_s7, %s147_s7 }
  0x2c   :  { %p154_p5 = por %p153_p4, %p152_p3 }
  0x2e   :  { %p155_p6 = pnand %p154_p5, %p148_p2 }
  0x33   :  { %v100_v10 = vpop.eup %99 }
  0x34   :  { %v102_v11 = vpop.eup %101  ;;  %v51_v12 = vmul.f32 %v100_v10, %v46_v8 }
  0x35   :  { %v53_v13 = vmul.f32 %v102_v11, %v47_v9 }
  0x37   :  { %v60_v14 = vadd.f32 %v53_v13, %v51_v12 }
  0x39   :  { %61 = vst [vmem:[#allocation7] sm:$0xff] %v60_v14 }
  0x3a   :  { %158 = shalt.err (!%p155_p6)
}
  0x3b   :  { %s159_s10 = scalar_lea.hbm %s233_s2, 128 }
  0x3c   :  { %p160_p7 = scmp.ne.s32.totalorder %s233_s2, %s159_s10  ;;  %p163_p8 = scmp.lt.u32.totalorder %s159_s10, %s233_s2 }
  0x3e   :  { %p165_p9 = pnand %p163_p8, %p160_p7 }
  0x40   :  { %168 = shalt.err (!%p165_p9)
}
  0x41   :  { %87 = dma.vmem_to_hbm [thread:$0]  %s85_s6, 128, %s233_s2, [#allocation4]  }
  0x42   :  { %173 = dma.done.wait [#allocation4], 128  }
  0x43   :  { %174 = vsyncadd [#allocation4], 4294967168 }
  0x44   :  { %91 = vsyncpa [#allocation3], 1 }
  0x45   :  { %92 = vsyncpa [#allocation6], 1 }
  0x46   :  { %93 = vsyncpa [#allocation4], 1 }

</bundles_post_ra>
